<compile_context>
chip_gen: v7x
topology: tpu7x:2x2x1
jax: 0.10.0
libtpu: 0.0.40
codegen_flags: <defaults>
</compile_context>

<pallas_src>
import functools

import jax
import jax.numpy as jnp
from jax.experimental import pallas as pl
from jax.experimental.pallas import tpu as pltpu


def _round_up(x, m):
    return ((x + m - 1) // m) * m


def _actor_kernel(ma_ref, x_ref, wx_ref, bx_ref, w1h_ref, w2h_ref, o_ref, *, H, A):
    """One batch tile of the Actor forward.

    ma_ref : (1, 1)       SMEM  max_action scalar
    x_ref  : (TB, S)      VMEM  state tile
    wx_ref : (S, Npad)    VMEM  fused x-side weights [W0 | W1_x | W2_x_pad]
    bx_ref : (1, Npad)    VMEM  fused biases        [b0 | b1   | b2_pad  ] (f32)
    w1h_ref: (H, H)       VMEM  W1 h-part
    w2h_ref: (H, A)       VMEM  W2 h-part
    o_ref  : (TB, A)      VMEM  output tile
    """
    w_dtype = wx_ref.dtype  # f32 or bf16 (MXU inputs only; accumulation is f32)
    x = x_ref[...]

    # Single wide MXU pass for every x-side contribution + fused bias add (f32).
    xw = (jnp.dot(x.astype(w_dtype), wx_ref[...],
                  preferred_element_type=jnp.float32)
          + bx_ref[...])

    # Layer 0: relu(x @ W0 + b0)   — lane-aligned slice 0:H.
    h0 = jnp.maximum(xw[:, :H], 0.0)

    # Layer 1 (dense skip): relu(h0 @ W1_h + (x @ W1_x + b1)).
    h1 = (jnp.dot(h0.astype(w_dtype), w1h_ref[...],
                  preferred_element_type=jnp.float32)
          + xw[:, H:2 * H])
    h1 = jnp.maximum(h1, 0.0)

    # Output layer (dense skip, no activation): h1 @ W2_h + (x @ W2_x + b2).
    a = (jnp.dot(h1.astype(w_dtype), w2h_ref[...],
                 preferred_element_type=jnp.float32)
         + xw[:, 2 * H:2 * H + A])

    # Actor head: max_action * tanh(a)   (f32 epilogue on the EUP/VPU).
    o_ref[...] = (ma_ref[0, 0] * jnp.tanh(a)).astype(o_ref.dtype)


def fuse_actor_params(params, weights_dtype=jnp.bfloat16, lane=128):
    """Fuse x-side weights/biases once on the wrapper side (lane-padded).

    Returns (Wx, bx, W1_h, W2_h) with
        Wx = [W0 | W1_x | pad(W2_x)]  of shape (S, 2H + round_up(A, lane)),
        bx = [b0 | b1   | pad(b2)  ]  of shape (1, 2H + round_up(A, lane)).
    Weights default to bf16 (MXU inputs); biases stay f32 for the f32 epilogue.
    """
    w0, b0, w1h, w1x, b1, w2h, w2x, b2 = params
    A = w2x.shape[1]
    a_pad = _round_up(A, lane) - A
    w2x_p = jnp.pad(w2x, ((0, 0), (0, a_pad)))
    b2_p = jnp.pad(b2, ((0, 0), (0, a_pad)))
    wx = jnp.concatenate([w0, w1x, w2x_p], axis=1).astype(weights_dtype)
    bx = jnp.concatenate([b0, b1, b2_p], axis=1).astype(jnp.float32)
    return wx, bx, w1h.astype(weights_dtype), w2h.astype(weights_dtype)


def actor_forward(state, fused_params, max_action, *, tile_b=512, min_grid_steps=1):
    """state: (B, S) float32 -> (B, A) float32.

    tile_b:         batch tile (multiple of 8); larger tiles -> fewer grid steps.
    min_grid_steps: set to 2 on v7x with large B so both TensorCores get work.
    """
    wx, bx, w1h, w2h = fused_params
    B, S = state.shape
    H = w1h.shape[0]
    A = w2h.shape[1]
    N = wx.shape[1]  # lane-padded 2H + round_up(A, 128)
    assert N >= 2 * H + A and bx.shape == (1, N) and w2h.shape == (H, A)

    # Batch tile: multiple of 8, the full batch when B is smaller, and split
    # into >= min_grid_steps blocks when requested (megacore sharding on v7x).
    if min_grid_steps > 1:
        tb = min(int(tile_b), max(8, _round_up(pl.cdiv(B, min_grid_steps), 8)))
    else:
        tb = min(int(tile_b), B)
    grid = (pl.cdiv(B, tb),)

    # Scalar max_action lives in SMEM (no recompile per value).
    ma = jnp.full((1, 1), max_action, dtype=jnp.float32)

    itemsize = lambda a: a.dtype.itemsize
    weight_bytes = (wx.size * itemsize(wx) + bx.size * itemsize(bx)
                    + w1h.size * itemsize(w1h) + w2h.size * itemsize(w2h))
    cost = pl.CostEstimate(
        flops=2 * B * (S * N + H * H + H * A),
        transcendentals=B * A,  # tanh
        bytes_accessed=state.size * itemsize(state) + weight_bytes + B * A * 4,
    )

    # Footprint-derived VMEM cap: double-buffered x/out tiles + resident weights
    # (Pallas still allocates 2 buffers each) + f32 intermediates, with 2x slack.
    approx_vmem = (2 * (tb * S + tb * A) * 4
                   + 2 * weight_bytes
                   + (tb * N + 2 * tb * H) * 4)
    vmem_limit = int(min(64 * 1024 * 1024, max(4 * 1024 * 1024, 2 * approx_vmem)))

    kernel = functools.partial(_actor_kernel, H=H, A=A)
    return pl.pallas_call(
        kernel,
        out_shape=jax.ShapeDtypeStruct((B, A), jnp.float32),
        grid=grid,
        in_specs=[
            pl.BlockSpec(memory_space=pltpu.MemorySpace.SMEM),   # max_action
            pl.BlockSpec((tb, S), lambda i: (i, 0)),             # x    (batch-tiled)
            pl.BlockSpec((S, N), lambda i: (0, 0)),              # Wx   (resident)
            pl.BlockSpec((1, N), lambda i: (0, 0)),              # bx   (resident)
            pl.BlockSpec((H, H), lambda i: (0, 0)),              # W1_h (resident)
            pl.BlockSpec((H, A), lambda i: (0, 0)),              # W2_h (resident)
        ],
        out_specs=pl.BlockSpec((tb, A), lambda i: (i, 0)),       # A never blocked
        compiler_params=pltpu.CompilerParams(
            dimension_semantics=("parallel",),   # v7x: shard batch across 2 TCs
            vmem_limit_bytes=vmem_limit,
        ),
        cost_estimate=cost,
    )(ma, state, wx, bx, w1h, w2h)


def init_actor_params(key, state_dim, action_dim, hidden=256):
    """Deterministic synthetic init (PyTorch-Linear-style uniform scaling)."""
    ks = jax.random.split(key, 8)

    def lin(k, fan_in, shape):
        bound = 1.0 / jnp.sqrt(fan_in)
        return jax.random.uniform(k, shape, jnp.float32, -bound, bound)

    S, A, H = state_dim, action_dim, hidden
    w0 = lin(ks[0], S, (S, H))
    b0 = lin(ks[1], S, (1, H))
    # fc1 has fan_in = H + S (dense skip); split weight into h-part and x-part.
    w1h = lin(ks[2], H + S, (H, H))
    w1x = lin(ks[3], H + S, (S, H))
    b1 = lin(ks[4], H + S, (1, H))
    # fc2 (output) also has fan_in = H + S.
    w2h = lin(ks[5], H + S, (H, A))
    w2x = lin(ks[6], H + S, (S, A))
    b2 = lin(ks[7], H + S, (1, A))
    return (w0, b0, w1h, w1x, b1, w2h, w2x, b2)


def actor_reference(state, params, max_action):
    """Pure-JAX reference mirroring the PyTorch forward (incl. concats)."""
    w0, b0, w1h, w1x, b1, w2h, w2x, b2 = params
    x = state
    h = jax.nn.relu(x @ w0 + b0)
    h = jnp.concatenate([h, x], axis=1) @ jnp.concatenate([w1h, w1x], axis=0) + b1
    h = jax.nn.relu(h)
    a = jnp.concatenate([h, x], axis=1) @ jnp.concatenate([w2h, w2x], axis=0) + b2
    return max_action * jnp.tanh(a)


if __name__ == "__main__":
    key = jax.random.PRNGKey(0)
    k_param, k_state, k_state2 = jax.random.split(key, 3)

    S, A, H = 16, 8, 256
    max_action = 2.0
    params = init_actor_params(k_param, S, A, hidden=H)

    # --- f32 weights, single batch block (tight tolerance) ---
    B = 8
    state = jax.random.normal(k_state, (B, S), dtype=jnp.float32)
    fused_f32 = fuse_actor_params(params, jnp.float32)
    out = jax.block_until_ready(actor_forward(state, fused_f32, max_action))
    ref = actor_reference(state, params, max_action)
    assert out.shape == (B, A)
    assert jnp.allclose(out, ref, atol=1e-5, rtol=1e-5), "f32 mismatch vs reference"

    # --- f32 weights, multi-step batch grid (weights resident across steps) ---
    B2 = 48
    state2 = jax.random.normal(k_state2, (B2, S), dtype=jnp.float32)
    out2 = jax.block_until_ready(
        actor_forward(state2, fused_f32, max_action, tile_b=16))
    ref2 = actor_reference(state2, params, max_action)
    assert out2.shape == (B2, A)
    assert jnp.allclose(out2, ref2, atol=1e-5, rtol=1e-5), "gridded mismatch vs reference"

    # --- default bf16 weights + 2-way grid split (v7x megacore path) ---
    fused_bf16 = fuse_actor_params(params)  # bf16 is now the default
    out_bf16 = jax.block_until_ready(
        actor_forward(state2, fused_bf16, max_action, min_grid_steps=2))
    assert out_bf16.shape == (B2, A)
    # bf16 path quantizes MXU inputs (weights AND activations); loose tolerance.
    assert jnp.allclose(out_bf16, ref2, atol=5e-2, rtol=5e-2), "bf16 mismatch vs reference"

    print("KERNEL_OK")
</pallas_src>

<mosaic_0001>
module attributes {stable_mosaic.version = 11 : i64} {
  func.func @_actor_kernel(%arg0: i32, %arg1: memref<1x1xf32, #tpu.memory_space<smem>>, %arg2: memref<8x16xf32, #tpu.memory_space<vmem>>, %arg3: memref<16x640xf32, #tpu.memory_space<vmem>>, %arg4: memref<1x640xf32, #tpu.memory_space<vmem>>, %arg5: memref<256x256xf32, #tpu.memory_space<vmem>>, %arg6: memref<256x8xf32, #tpu.memory_space<vmem>>, %arg7: memref<8x8xf32, #tpu.memory_space<vmem>>) attributes {dimension_semantics = [#tpu.dimension_semantics<parallel>], iteration_bounds = array<i64: 1>, scalar_prefetch = 0 : i64, scratch_operands = 0 : i64, tpu.core_type = #tpu.core_type<tc>, window_params = [{transform_indices = @transform_0, window_bounds = array<i64: 1, 1>}, {transform_indices = @transform_1, window_bounds = array<i64: 8, 16>}, {pipeline_mode = #tpu.pipeline_mode<synchronous>, transform_indices = @transform_2, window_bounds = array<i64: 16, 640>}, {pipeline_mode = #tpu.pipeline_mode<synchronous>, transform_indices = @transform_3, window_bounds = array<i64: 1, 640>}, {pipeline_mode = #tpu.pipeline_mode<synchronous>, transform_indices = @transform_4, window_bounds = array<i64: 256, 256>}, {pipeline_mode = #tpu.pipeline_mode<synchronous>, transform_indices = @transform_5, window_bounds = array<i64: 256, 8>}, {transform_indices = @transform_6, window_bounds = array<i64: 8, 8>}]} {
    %c0 = arith.constant 0 : index
    %c0_0 = arith.constant 0 : index
    %0 = vector.load %arg2[%c0, %c0_0] : memref<8x16xf32, #tpu.memory_space<vmem>>, vector<8x16xf32>
    %c0_1 = arith.constant 0 : index
    %c0_2 = arith.constant 0 : index
    %1 = vector.load %arg3[%c0_1, %c0_2] : memref<16x640xf32, #tpu.memory_space<vmem>>, vector<16x640xf32>
    %cst = arith.constant dense<0.000000e+00> : vector<8x640xf32>
    %2 = tpu.matmul %0, %1, %cst {dimension_numbers = #tpu.dot_dimension_numbers<[1], [0], [0], [1], [0, 0, 1, 1], [], []>} : vector<8x16xf32>, vector<16x640xf32>, vector<8x640xf32> -> vector<8x640xf32>
    %c0_3 = arith.constant 0 : index
    %c0_4 = arith.constant 0 : index
    %3 = vector.load %arg4[%c0_3, %c0_4] : memref<1x640xf32, #tpu.memory_space<vmem>>, vector<1x640xf32>
    %4 = vector.broadcast %3 : vector<1x640xf32> to vector<8x640xf32>
    %5 = arith.addf %2, %4 : vector<8x640xf32>
    %6 = vector.extract_strided_slice %5 {offsets = [0, 0], sizes = [8, 256], strides = [1, 1]} : vector<8x640xf32> to vector<8x256xf32>
    %cst_5 = arith.constant 0.000000e+00 : f32
    %7 = vector.broadcast %cst_5 : f32 to vector<8x256xf32>
    %8 = arith.maximumf %6, %7 : vector<8x256xf32>
    %c0_6 = arith.constant 0 : index
    %c0_7 = arith.constant 0 : index
    %9 = vector.load %arg5[%c0_6, %c0_7] : memref<256x256xf32, #tpu.memory_space<vmem>>, vector<256x256xf32>
    %cst_8 = arith.constant dense<0.000000e+00> : vector<8x256xf32>
    %10 = tpu.matmul %8, %9, %cst_8 {dimension_numbers = #tpu.dot_dimension_numbers<[1], [0], [0], [1], [0, 0, 1, 1], [], []>} : vector<8x256xf32>, vector<256x256xf32>, vector<8x256xf32> -> vector<8x256xf32>
    %11 = vector.extract_strided_slice %5 {offsets = [0, 256], sizes = [8, 256], strides = [1, 1]} : vector<8x640xf32> to vector<8x256xf32>
    %12 = arith.addf %10, %11 : vector<8x256xf32>
    %cst_9 = arith.constant 0.000000e+00 : f32
    %13 = vector.broadcast %cst_9 : f32 to vector<8x256xf32>
    %14 = arith.maximumf %12, %13 : vector<8x256xf32>
    %c0_10 = arith.constant 0 : index
    %c0_11 = arith.constant 0 : index
    %15 = vector.load %arg6[%c0_10, %c0_11] : memref<256x8xf32, #tpu.memory_space<vmem>>, vector<256x8xf32>
    %cst_12 = arith.constant dense<0.000000e+00> : vector<8x8xf32>
    %16 = tpu.matmul %14, %15, %cst_12 {dimension_numbers = #tpu.dot_dimension_numbers<[1], [0], [0], [1], [0, 0, 1, 1], [], []>} : vector<8x256xf32>, vector<256x8xf32>, vector<8x8xf32> -> vector<8x8xf32>
    %17 = vector.extract_strided_slice %5 {offsets = [0, 512], sizes = [8, 8], strides = [1, 1]} : vector<8x640xf32> to vector<8x8xf32>
    %18 = arith.addf %16, %17 : vector<8x8xf32>
    %c0_13 = arith.constant 0 : index
    %c0_14 = arith.constant 0 : index
    %19 = memref.load %arg1[%c0_13, %c0_14] : memref<1x1xf32, #tpu.memory_space<smem>>
    %20 = math.tanh %18 : vector<8x8xf32>
    %21 = vector.broadcast %19 : f32 to vector<8x8xf32>
    %22 = arith.mulf %21, %20 : vector<8x8xf32>
    %c0_15 = arith.constant 0 : index
    %c0_16 = arith.constant 0 : index
    %23 = vector.load %arg7[%c0_15, %c0_16] : memref<8x8xf32, #tpu.memory_space<vmem>>, vector<8x8xf32>
    tpu.vector_store %arg7[%c0_15, %c0_16], %22 {strides = array<i32>} : memref<8x8xf32, #tpu.memory_space<vmem>>, vector<8x8xf32>,
    return
  }
  func.func @transform_0(%arg0: i32) -> (i32, i32) {
    %c0_i32 = arith.constant 0 : i32
    %c0_i32_0 = arith.constant 0 : i32
    %c0_i32_1 = arith.constant 0 : i32
    return %c0_i32, %c0_i32_0 : i32, i32
  }
  func.func @transform_1(%arg0: i32) -> (i32, i32) {
    %c0_i32 = arith.constant 0 : i32
    %c0_i32_0 = arith.constant 0 : i32
    return %arg0, %c0_i32 : i32, i32
  }
  func.func @transform_2(%arg0: i32) -> (i32, i32) {
    %c0_i32 = arith.constant 0 : i32
    %c0_i32_0 = arith.constant 0 : i32
    %c0_i32_1 = arith.constant 0 : i32
    return %c0_i32, %c0_i32_0 : i32, i32
  }
  func.func @transform_3(%arg0: i32) -> (i32, i32) {
    %c0_i32 = arith.constant 0 : i32
    %c0_i32_0 = arith.constant 0 : i32
    %c0_i32_1 = arith.constant 0 : i32
    return %c0_i32, %c0_i32_0 : i32, i32
  }
  func.func @transform_4(%arg0: i32) -> (i32, i32) {
    %c0_i32 = arith.constant 0 : i32
    %c0_i32_0 = arith.constant 0 : i32
    %c0_i32_1 = arith.constant 0 : i32
    return %c0_i32, %c0_i32_0 : i32, i32
  }
  func.func @transform_5(%arg0: i32) -> (i32, i32) {
    %c0_i32 = arith.constant 0 : i32
    %c0_i32_0 = arith.constant 0 : i32
    %c0_i32_1 = arith.constant 0 : i32
    return %c0_i32, %c0_i32_0 : i32, i32
  }
  func.func @transform_6(%arg0: i32) -> (i32, i32) {
    %c0_i32 = arith.constant 0 : i32
    %c0_i32_0 = arith.constant 0 : i32
    return %arg0, %c0_i32 : i32, i32
  }
}

</mosaic_0001>

<bundles_post_ra>
// kernel: tpu_custom_call.1
= control target key start
LH: loop header
LB: loop body
LE: loop exit
PB: predicated region body
PF: predicated region fallthrough
CT: control target
= control target key end

     0   :  { %12 = vsyncpa [#allocation4], 0  ;;  %s983_s0 = inlined_call_operand.<no memory space> [shape: f32[1,1], index: 0, kind: input, shape index: {}]   ;;  %s984_s1 = inlined_call_operand.vmem [shape: f32[8,16], index: 1, kind: input, shape index: {}]   ;;  %s985_s2 = inlined_call_operand.vmem [shape: f32[16,640], index: 2, kind: input, shape index: {}]   ;;  %s986_s3 = inlined_call_operand.vmem [shape: f32[1,640], index: 3, kind: input, shape index: {}]   ;;  %s987_s4 = inlined_call_operand.hbm [shape: f32[256,256], index: 4, kind: input, shape index: {}]   ;;  %s988_s5 = inlined_call_operand.vmem [shape: f32[256,8], index: 5, kind: input, shape index: {}]   ;;  %s989_s6 = inlined_call_operand.hbm [shape: f32[8,8], index: 6, kind: output, shape index: {}]  }
   0x1   :  { %13 = vsyncpa [#allocation5], 0  ;;  %s771_s21 = smov [#allocation3]   ;;  %s723_s25 = scalar_lea.hbm %s987_s4, 8192 }
   0x2   :  { %s27_s22 = sshll.u32 %s771_s21, 4  ;;  %p724_p0 = scmp.ne.s32.totalorder %s987_s4, %s723_s25  ;;  %s28_s22 = int_to_ptr.vmem [resolvable:$true] %s27_s22 }
   0x3   :  { %p727_p1 = scmp.lt.u32.totalorder %s723_s25, %s987_s4 }
   0x5   :  { %p729_p2 = pnand %p727_p1, %p724_p0 }
   0x7   :  { %732 = shalt.err (!%p729_p2)
}
   0x8   :  { %s733_s30 = scalar_lea.vmem %s28_s22, 8192  ;;  %p738_p4 = scmp.lt.s32.totalorder %s28_s22, %s28_s22 }
   0x9   :  { %p734_p3 = scmp.ne.s32.totalorder %s28_s22, %s733_s30  ;;  %p739_p5 = scmp.lt.s32.totalorder %s733_s30, %s733_s30 }
   0xb   :  { %p740_p6 = por %p739_p5, %p738_p4 }
   0xd   :  { %p741_p7 = pnand %p740_p6, %p734_p3 }
   0xf   :  { %744 = shalt.err (!%p741_p7)
}
  0x10   :  { %s772_s7 = smov 256   ;;  %s773_s8 = smov 16  }
  0x11   :  { %33 = dma.hbm_to_vmem [thread:$0]  %s987_s4, 8192, %s28_s22, [#allocation4], %s772_s7, %s772_s7, %s773_s8  }
  0x12   :  { %767 = dma.done.wait [#allocation4], 8192  }
  0x13   :  { %768 = vsyncadd [#allocation4], 4294959104  ;;  %v774_v0 = vmov 0.0   ;;  %v41_v1 = vld [vmem:[%s985_s2 + $0x8] sm:$0xff]  ;;  %v46_v2 = vld [vmem:[%s985_s2 + $0x30] sm:$0xff]  ;;  %vm77_vm0 = vcmask 130048  }
  0x14   :  { %145 = vmatprep.mubr.f32.mxu0 %v774_v0  ;;  %v40_v3 = vld [vmem:[%s985_s2] sm:$0xff]  ;;  %v603_v4 = vpack.c.bf16 %v46_v2, %v41_v1  ;;  %v45_v5 = vld [vmem:[%s985_s2 + $0x28] sm:$0xff]  ;;  %v298_v9 = vld [vmem:[#allocation3 + $0x18] sm:$0xff]  ;;  %vm776_vm1 = vmmov 0   ;;  %s777_s4 = smov [#allocation6]   ;;  %vm538_vm2 = vcmask 64512  }
  0x15   :  { %v296_v6 = vld [vmem:[#allocation3 + $0x8] sm:$0xff]  ;;  %v605_v7 = vpack.c.bf16 %v45_v5, %v40_v3  ;;  %v841_v8 = vld [vmem:[%s984_s1] sm:$0xff]  ;;  %v297_v11 = vld [vmem:[#allocation3 + $0x10] sm:$0xff]  ;;  %s546_s18 = sshll.u32 %s777_s4, 4  ;;  %s547_s18 = int_to_ptr.vmem [resolvable:$true] %s546_s18 }
  0x16   :  { %v295_v10 = vld [vmem:[#allocation3] sm:$0xff]  ;;  %604 = vmatprep.subr.bf16.mxu0 %v603_v4  ;;  %v614_v12 = vpack.c.bf16 %v298_v9, %v296_v6  ;;  %v300_v14 = vld [vmem:[#allocation3 + $0x28] sm:$0xff]  ;;  %v302_v15 = vld [vmem:[#allocation3 + $0x38] sm:$0xff]  ;;  %s745_s19 = scalar_lea.vmem %s547_s18, 128  ;;  %p750_p9 = scmp.lt.s32.totalorder %s547_s18, %s547_s18 }
  0x17   :  { %v616_v13 = vpack.c.bf16 %v297_v11, %v295_v10  ;;  %v299_v16 = vld [vmem:[#allocation3 + $0x20] sm:$0xff]  ;;  %606 = vmatpush1.bf16.msra.mxu0 %v605_v7  ;;  %v618_v17 = vpack.c.bf16 %v302_v15, %v300_v14  ;;  %v301_v18 = vld [vmem:[#allocation3 + $0x30] sm:$0xff]  ;;  %v304_v19 = vld [vmem:[#allocation3 + $0x48] sm:$0xff]  ;;  %p746_p8 = scmp.ne.s32.totalorder %s547_s18, %s745_s19  ;;  %p751_p10 = scmp.lt.s32.totalorder %s745_s19, %s745_s19 }
  0x18   :  { %v306_v20 = vld [vmem:[#allocation3 + $0x58] sm:$0xff]  ;;  %615 = vmatprep.subr.bf16.mxu1 %v614_v12  ;;  %v620_v21 = vpack.c.bf16 %v301_v18, %v299_v16  ;;  %v303_v23 = vld [vmem:[#allocation3 + $0x40] sm:$0xff]  ;;  %v305_v24 = vld [vmem:[#allocation3 + $0x50] sm:$0xff] }
  0x19   :  { %617 = vmatpush1.bf16.msra.mxu1 %v616_v13  ;;  %v622_v22 = vpack.c.bf16 %v306_v20, %v304_v19  ;;  %v308_v25 = vld [vmem:[#allocation3 + $0x68] sm:$0xff]  ;;  %v310_v26 = vld [vmem:[#allocation3 + $0x78] sm:$0xff]  ;;  %v624_v27 = vpack.c.bf16 %v305_v24, %v303_v23  ;;  %v307_v29 = vld [vmem:[#allocation3 + $0x60] sm:$0xff]  ;;  %p752_p11 = por %p751_p10, %p750_p9 }
  0x1a   :  { %555 = vmatmul.mubr.msk.f32.vlgmr.msra.gmra.mrb[0].mxu0 %vm77_vm0, %v841_v8  ;;  %619 = vmatprep.subr.bf16.mxu1 %v618_v17  ;;  %v626_v28 = vpack.c.bf16 %v310_v26, %v308_v25  ;;  %v309_v30 = vld [vmem:[#allocation3 + $0x70] sm:$0xff]  ;;  %v312_v31 = vld [vmem:[#allocation3 + $0x88] sm:$0xff]  ;;  %v314_v32 = vld [vmem:[#allocation3 + $0x98] sm:$0xff] }
  0x1b   :  { %216 = vmatprep.mubr.f32.mxu0 %v774_v0  ;;  %v628_v33 = vpack.c.bf16 %v309_v30, %v307_v29  ;;  %v630_v34 = vpack.c.bf16 %v314_v32, %v312_v31  ;;  %v311_v35 = vld [vmem:[#allocation3 + $0x80] sm:$0xff]  ;;  %v313_v36 = vld [vmem:[#allocation3 + $0x90] sm:$0xff]  ;;  %v316_v37 = vld [vmem:[#allocation3 + $0xa8] sm:$0xff]  ;;  %p753_p12 = pnand %p752_p11, %p746_p8 }
  0x1c   :  { %v318_v38 = vld [vmem:[#allocation3 + $0xb8] sm:$0xff]  ;;  %v632_v39 = vpack.c.bf16 %v313_v36, %v311_v35  ;;  %v315_v41 = vld [vmem:[#allocation3 + $0xa0] sm:$0xff]  ;;  %v317_v42 = vld [vmem:[#allocation3 + $0xb0] sm:$0xff] }
  0x1d   :  { %621 = vmatpush1.bf16.msra.mxu1 %v620_v21  ;;  %v634_v40 = vpack.c.bf16 %v318_v38, %v316_v37  ;;  %v320_v43 = vld [vmem:[#allocation3 + $0xc8] sm:$0xff]  ;;  %v322_v44 = vld [vmem:[#allocation3 + $0xd8] sm:$0xff]  ;;  %v636_v45 = vpack.c.bf16 %v317_v42, %v315_v41  ;;  %v319_v47 = vld [vmem:[#allocation3 + $0xc0] sm:$0xff] }
  0x1e   :  { %623 = vmatprep.subr.bf16.mxu1 %v622_v22  ;;  %v638_v46 = vpack.c.bf16 %v322_v44, %v320_v43  ;;  %v321_v48 = vld [vmem:[#allocation3 + $0xd0] sm:$0xff]  ;;  %v324_v49 = vld [vmem:[#allocation3 + $0xe8] sm:$0xff]  ;;  %v326_v50 = vld [vmem:[#allocation3 + $0xf8] sm:$0xff] }
  0x1f   :  { %v640_v51 = vpack.c.bf16 %v321_v48, %v319_v47  ;;  %v642_v52 = vpack.c.bf16 %v326_v50, %v324_v49  ;;  %v323_v53 = vld [vmem:[#allocation3 + $0xe0] sm:$0xff]  ;;  %v325_v54 = vld [vmem:[#allocation3 + $0xf0] sm:$0xff]  ;;  %v328_v55 = vld [vmem:[#allocation3 + $0x108] sm:$0xff] }
  0x20   :  { %v330_v56 = vld [vmem:[#allocation3 + $0x118] sm:$0xff]  ;;  %v644_v57 = vpack.c.bf16 %v325_v54, %v323_v53  ;;  %v327_v59 = vld [vmem:[#allocation3 + $0x100] sm:$0xff]  ;;  %v329_v60 = vld [vmem:[#allocation3 + $0x110] sm:$0xff] }
  0x21   :  { %625 = vmatpush1.bf16.msra.mxu1 %v624_v27  ;;  %v646_v58 = vpack.c.bf16 %v330_v56, %v328_v55  ;;  %v332_v61 = vld [vmem:[#allocation3 + $0x128] sm:$0xff]  ;;  %v334_v62 = vld [vmem:[#allocation3 + $0x138] sm:$0xff]  ;;  %v648_v63 = vpack.c.bf16 %v329_v60, %v327_v59  ;;  %v331_v2 = vld [vmem:[#allocation3 + $0x120] sm:$0xff] }
  0x22   :  { %627 = vmatprep.subr.bf16.mxu1 %v626_v28  ;;  %v650_v1 = vpack.c.bf16 %v334_v62, %v332_v61  ;;  %v333_v3 = vld [vmem:[#allocation3 + $0x130] sm:$0xff]  ;;  %v336_v4 = vld [vmem:[#allocation3 + $0x148] sm:$0xff]  ;;  %v338_v5 = vld [vmem:[#allocation3 + $0x158] sm:$0xff] }
  0x23   :  { %v652_v6 = vpack.c.bf16 %v333_v3, %v331_v2  ;;  %v654_v7 = vpack.c.bf16 %v338_v5, %v336_v4  ;;  %v335_v9 = vld [vmem:[#allocation3 + $0x140] sm:$0xff]  ;;  %v337_v10 = vld [vmem:[#allocation3 + $0x150] sm:$0xff]  ;;  %v340_v11 = vld [vmem:[#allocation3 + $0x168] sm:$0xff] }
  0x24   :  { %v342_v12 = vld [vmem:[#allocation3 + $0x178] sm:$0xff]  ;;  %v656_v13 = vpack.c.bf16 %v337_v10, %v335_v9  ;;  %v339_v15 = vld [vmem:[#allocation3 + $0x160] sm:$0xff]  ;;  %v341_v16 = vld [vmem:[#allocation3 + $0x170] sm:$0xff] }
  0x25   :  { %629 = vmatpush1.bf16.msra.mxu1 %v628_v33  ;;  %v658_v14 = vpack.c.bf16 %v342_v12, %v340_v11  ;;  %v344_v17 = vld [vmem:[#allocation3 + $0x188] sm:$0xff]  ;;  %v346_v18 = vld [vmem:[#allocation3 + $0x198] sm:$0xff]  ;;  %v660_v19 = vpack.c.bf16 %v341_v16, %v339_v15  ;;  %v343_v21 = vld [vmem:[#allocation3 + $0x180] sm:$0xff] }
  0x26   :  { %631 = vmatprep.subr.bf16.mxu1 %v630_v34  ;;  %v662_v20 = vpack.c.bf16 %v346_v18, %v344_v17  ;;  %v345_v22 = vld [vmem:[#allocation3 + $0x190] sm:$0xff]  ;;  %v348_v23 = vld [vmem:[#allocation3 + $0x1a8] sm:$0xff]  ;;  %v350_v24 = vld [vmem:[#allocation3 + $0x1b8] sm:$0xff] }
  0x27   :  { %v664_v25 = vpack.c.bf16 %v345_v22, %v343_v21  ;;  %v666_v26 = vpack.c.bf16 %v350_v24, %v348_v23  ;;  %v347_v27 = vld [vmem:[#allocation3 + $0x1a0] sm:$0xff]  ;;  %v349_v28 = vld [vmem:[#allocation3 + $0x1b0] sm:$0xff]  ;;  %v352_v29 = vld [vmem:[#allocation3 + $0x1c8] sm:$0xff] }
  0x28   :  { %v354_v30 = vld [vmem:[#allocation3 + $0x1d8] sm:$0xff]  ;;  %v668_v31 = vpack.c.bf16 %v349_v28, %v347_v27  ;;  %v48_v34 = vld [vmem:[%s985_s2 + $0x40] sm:$0xff]  ;;  %v353_v37 = vld [vmem:[#allocation3 + $0x1d0] sm:$0xff]  ;;  %v52_v27 = vlaneseq }
  0x29   :  { %633 = vmatpush1.bf16.msra.mxu1 %v632_v39  ;;  %v670_v32 = vpack.c.bf16 %v354_v30, %v352_v29  ;;  %v43_v33 = vld [vmem:[%s985_s2 + $0x18] sm:$0xff]  ;;  %v351_v35 = vld [vmem:[#allocation3 + $0x1c0] sm:$0xff]  ;;  %v42_v38 = vld [vmem:[%s985_s2 + $0x10] sm:$0xff] }
  0x2a   :  { %635 = vmatprep.subr.bf16.mxu1 %v634_v40  ;;  %v607_v36 = vpack.c.bf16 %v48_v34, %v43_v33  ;;  %v47_v39 = vld [vmem:[%s985_s2 + $0x38] sm:$0xff]  ;;  %v672_v40 = vpack.c.bf16 %v353_v37, %v351_v35  ;;  %v356_v42 = vld [vmem:[#allocation3 + $0x1e8] sm:$0xff]  ;;  %v44_v48 = vld [vmem:[%s985_s2 + $0x20] sm:$0xff]  ;;  %v53_v28 = vshrl.u32 %v52_v27, 7 }
  0x2b   :  { %v609_v41 = vpack.c.bf16 %v47_v39, %v42_v38  ;;  %v358_v43 = vld [vmem:[#allocation3 + $0x1f8] sm:$0xff]  ;;  %v49_v49 = vld [vmem:[%s985_s2 + $0x48] sm:$0xff]  ;;  %v448_v50 = vld [vmem:[%s988_s5 + $0x80] sm:$0xff] }
  0x2c   :  { %608 = vmatprep.subr.bf16.mxu0 %v607_v36  ;;  %v674_v44 = vpack.c.bf16 %v358_v43, %v356_v42  ;;  %v449_v53 = vld [vmem:[%s988_s5 + $0x88] sm:$0xff]  ;;  %v432_v54 = vld [vmem:[%s988_s5] sm:$0xff]  ;;  %v434_v60 = vld [vmem:[%s988_s5 + $0x10] sm:$0xff]  ;;  %v54_v29 = vsub.s32 0, %v53_v28 }
  0x2d   :  { %637 = vmatpush1.bf16.msra.mxu1 %v636_v45  ;;  %610 = vmatpush1.bf16.msra.mxu0 %v609_v41  ;;  %v355_v45 = vld [vmem:[#allocation3 + $0x1e0] sm:$0xff]  ;;  %v433_v55 = vld [vmem:[%s988_s5 + $0x8] sm:$0xff]  ;;  %v678_v56 = vpack.c.bf16 %v449_v53, %v448_v50  ;;  %v435_v61 = vld [vmem:[%s988_s5 + $0x18] sm:$0xff]  ;;  %v62_v53 = vsub.s32 2, %v53_v28 }
  0x2e   :  { %639 = vmatprep.subr.bf16.mxu1 %v638_v46  ;;  %v357_v46 = vld [vmem:[#allocation3 + $0x1f0] sm:$0xff]  ;;  %v452_v62 = vld [vmem:[%s988_s5 + $0xa0] sm:$0xff]  ;;  %v437_v4 = vld [vmem:[%s988_s5 + $0x28] sm:$0xff] }
  0x2f   :  { %v676_v47 = vpack.c.bf16 %v357_v46, %v355_v45  ;;  %v436_v3 = vld [vmem:[%s988_s5 + $0x20] sm:$0xff]  ;;  %v454_v5 = vld [vmem:[%s988_s5 + $0xb0] sm:$0xff]  ;;  %v439_v10 = vld [vmem:[%s988_s5 + $0x38] sm:$0xff] }
  0x30   :  { %556 = vmatmul.mubr.msk.f32.vlgmr.msra.gmra.mrb[2].mxu0 %vm77_vm0, %v841_v8  ;;  %v438_v9 = vld [vmem:[%s988_s5 + $0x30] sm:$0xff]  ;;  %v456_v11 = vld [vmem:[%s988_s5 + $0xc0] sm:$0xff]  ;;  %v457_v12 = vld [vmem:[%s988_s5 + $0xc8] sm:$0xff] }
  0x31   :  { %641 = vmatpush1.bf16.msra.mxu1 %v640_v51  ;;  %v775_v51 = vmov 0.0|0.0   ;;  %600 = vmatprep.mubr.msk.f32.mxu0 %vm776_vm1, %v774_v0  ;;  %v451_v0 = vld [vmem:[%s988_s5 + $0x98] sm:$0xff]  ;;  %v440_v15 = vld [vmem:[%s988_s5 + $0x40] sm:$0xff]  ;;  %v441_v16 = vld [vmem:[%s988_s5 + $0x48] sm:$0xff] }
  0x32   :  { %643 = vmatprep.subr.bf16.mxu1 %v642_v52  ;;  %611 = vmatprep.subr.bf16.mxu0 %v775_v51  ;;  %v612_v52 = vpack.c.bf16 %v49_v49, %v44_v48  ;;  %v458_v17 = vld [vmem:[%s988_s5 + $0xd0] sm:$0xff]  ;;  %v459_v18 = vld [vmem:[%s988_s5 + $0xd8] sm:$0xff]  ;;  %v460_v24 = vld [vmem:[%s988_s5 + $0xe0] sm:$0xff] }
  0x33   :  { %v442_v21 = vld [vmem:[%s988_s5 + $0x50] sm:$0xff]  ;;  %v443_v22 = vld [vmem:[%s988_s5 + $0x58] sm:$0xff]  ;;  %v50_v30 = vld [vmem:[%s986_s3] sm:$0x1f] }
  0x34   :  { %613 = vmatpush3.bf16.msra.mxu0 %v612_v52  ;;  %v700_v23 = vpack.c.bf16 %v443_v22, %v442_v21  ;;  %v444_v41 = vld [vmem:[%s988_s5 + $0x60] sm:$0xff]  ;;  %v445_v42 = vld [vmem:[%s988_s5 + $0x68] sm:$0xff]  ;;  %v462_v45 = vld [vmem:[%s988_s5 + $0xf0] sm:$0xff] }
  0x35   :  { %645 = vmatpush1.bf16.msra.mxu1 %v644_v57  ;;  %v450_v57 = vld [vmem:[%s988_s5 + $0x90] sm:$0xff]  ;;  %679 = vmatprep.subr.bf16.mxu0 %v678_v56  ;;  %v463_v46 = vld [vmem:[%s988_s5 + $0xf8] sm:$0xff] }
  0x36   :  { %647 = vmatprep.subr.bf16.mxu1 %v646_v58  ;;  %v680_v58 = vpack.c.bf16 %v433_v55, %v432_v54  ;;  %v682_v59 = vpack.c.bf16 %v451_v0, %v450_v57  ;;  %v446_v48 = vld [vmem:[%s988_s5 + $0x70] sm:$0xff]  ;;  %v447_v49 = vld [vmem:[%s988_s5 + $0x78] sm:$0xff]  ;;  %v66_v54 = vsub.s32 3, %v53_v28  ;;  %v63_v55 = vrot.slane %v50_v30, %v62_v53 }
  0x37   :  { %601 = vmatmul.mubr.msk.f32.vlgmr.msra.gmra.mrb[4].mxu0 %vm77_vm0, %v841_v8  ;;  %v455_v8 = vld [vmem:[%s988_s5 + $0xb8] sm:$0xff]  ;;  %v708_v50 = vpack.c.bf16 %v447_v49, %v446_v48 }
  0x38   :  { %681 = vmatpush3.bf16.msra.mxu0 %v680_v58  ;;  %v67_v56 = vrot.slane %v50_v30, %v66_v54 }
  0x39   :  { %649 = vmatpush1.bf16.msra.mxu1 %v648_v63  ;;  %v453_v63 = vld [vmem:[%s988_s5 + $0xa8] sm:$0xff]  ;;  %683 = vmatprep.subr.bf16.mxu0 %v682_v59 }
  0x3a   :  { %651 = vmatprep.subr.bf16.mxu1 %v650_v1  ;;  %v684_v1 = vpack.c.bf16 %v435_v61, %v434_v60  ;;  %v686_v2 = vpack.c.bf16 %v453_v63, %v452_v62 }
  0x3c   :  { %685 = vmatpush3.bf16.msra.mxu0 %v684_v1  ;;  %v70_v1 = vsub.s32 4, %v53_v28 }
  0x3d   :  { %653 = vmatpush1.bf16.msra.mxu1 %v652_v6  ;;  %v688_v6 = vpack.c.bf16 %v437_v4, %v436_v3  ;;  %687 = vmatprep.subr.bf16.mxu0 %v686_v2 }
  0x3e   :  { %655 = vmatprep.subr.bf16.mxu1 %v654_v7  ;;  %v690_v7 = vpack.c.bf16 %v455_v8, %v454_v5  ;;  %v71_v2 = vrot.slane %v50_v30, %v70_v1 }
  0x40   :  { %689 = vmatpush3.bf16.msra.mxu0 %v688_v6 }
  0x41   :  { %657 = vmatpush1.bf16.msra.mxu1 %v656_v13  ;;  %v692_v13 = vpack.c.bf16 %v439_v10, %v438_v9  ;;  %691 = vmatprep.subr.bf16.mxu0 %v690_v7  ;;  %v536_v7 = vstv %s983_s0 }
  0x42   :  { %659 = vmatprep.subr.bf16.mxu1 %v658_v14  ;;  %v694_v14 = vpack.c.bf16 %v457_v12, %v456_v11 }
  0x44   :  { %693 = vmatpush3.bf16.msra.mxu0 %v692_v13 }
  0x45   :  { %661 = vmatpush1.bf16.msra.mxu1 %v660_v19  ;;  %v696_v19 = vpack.c.bf16 %v441_v16, %v440_v15  ;;  %695 = vmatprep.subr.bf16.mxu0 %v694_v14 }
  0x46   :  { %663 = vmatprep.subr.bf16.mxu1 %v662_v20  ;;  %v698_v20 = vpack.c.bf16 %v459_v18, %v458_v17 }
  0x48   :  { %697 = vmatpush3.bf16.msra.mxu0 %v696_v19 }
  0x49   :  { %665 = vmatpush1.bf16.msra.mxu1 %v664_v25  ;;  %699 = vmatprep.subr.bf16.mxu0 %v698_v20  ;;  %v461_v25 = vld [vmem:[%s988_s5 + $0xe8] sm:$0xff] }
  0x4a   :  { %667 = vmatprep.subr.bf16.mxu1 %v666_v26  ;;  %v702_v26 = vpack.c.bf16 %v461_v25, %v460_v24 }
  0x4c   :  { %701 = vmatpush3.bf16.msra.mxu0 %v700_v23 }
  0x4d   :  { %669 = vmatpush1.bf16.msra.mxu1 %v668_v31  ;;  %703 = vmatprep.subr.bf16.mxu0 %v702_v26  ;;  %v58_v31 = vsub.s32 1, %v53_v28 }
  0x4e   :  { %671 = vmatprep.subr.bf16.mxu1 %v670_v32  ;;  %v55_v32 = vrot.slane %v50_v30, %v54_v29 }
  0x4f   :  { %v59_v33 = vrot.slane %v50_v30, %v58_v31 }
  0x51   :  { %673 = vmatpush1.bf16.msra.mxu1 %v672_v40 }
  0x52   :  { %675 = vmatprep.subr.bf16.mxu1 %v674_v44  ;;  %v704_v44 = vpack.c.bf16 %v445_v42, %v444_v41 }
  0x54   :  { %705 = vmatpush3.bf16.msra.mxu0 %v704_v44 }
  0x55   :  { %677 = vmatpush1.bf16.msra.mxu1 %v676_v47  ;;  %v706_v47 = vpack.c.bf16 %v463_v46, %v462_v45 }
  0x57   :  { %707 = vmatprep.subr.bf16.mxu0 %v706_v47 }
  0x58   :  { %709 = vmatpush3.bf16.msra.mxu0 %v708_v50 }
  0xed   :  { %v147_v34 = vpop.f32.mrb[0].mxu0 }
  0xee   :  { %v148_v35 = vadd.f32 %v147_v34, %v55_v32  ;;  %v149_v36 = vpop.f32.mrb[1].mxu0 }
  0xef   :  { %v150_v37 = vadd.f32 %v149_v36, %v59_v33 }
  0xf0   :  { %v293_v39 = vmax.f32 %v148_v35, 0.0 }
  0xf1   :  { %v294_v38 = vmax.f32 %v150_v37, 0.0 }
  0xf3   :  { %423 = vmatprep.mubr.f32.mxu1 %v294_v38 }
  0xf4   :  { %424 = vmatmul.mubr.f32.vlgmr.msra.gmra.mrb[0].mxu1 %v293_v39 }
 0x103   :  { %v218_v40 = vpop.f32.mrb[2].mxu0 }
 0x104   :  { %v220_v43 = vpop.f32.mrb[3].mxu0  ;;  %v219_v57 = vadd.f32 %v218_v40, %v63_v55 }
 0x105   :  { %v221_v0 = vadd.f32 %v220_v43, %v67_v56 }
 0x10a   :  { %v289_v51 = vpop.f32.mrb[4].mxu0 }
 0x10b   :  { %v602_v52 = vpop.f32.mrb[5].mxu0  ;;  %v290_v5 = vadd.f32 %v289_v51, %v71_v2 }
 0x1c7   :  { %v425_v58 = vpop.f32.mrb[0].mxu1 }
 0x1c8   :  { %v426_v59 = vadd.f32 %v425_v58, %v219_v57  ;;  %v427_v60 = vpop.f32.mrb[1].mxu1 }
 0x1c9   :  { %v428_v61 = vadd.f32 %v427_v60, %v221_v0 }
 0x1ca   :  { %v430_v63 = vmax.f32 %v426_v59, 0.0 }
 0x1cb   :  { %v431_v62 = vmax.f32 %v428_v61, 0.0 }
 0x1cd   :  { %528 = vmatprep.mubr.f32.mxu0 %v431_v62 }
 0x1ce   :  { %529 = vmatmul.mubr.f32.vlgmr.msra.gmra.mrb[6].mxu0 %v430_v63 }
 0x2a1   :  { %v593_v3 = vpop.f32.mrb[6].mxu0 }
 0x2a2   :  { %v594_v4 = vpop.f32.mrb[7].mxu0 }
 0x2a3   :  { %v595_v8 = vadd.f32 %v594_v4, %v593_v3 }
 0x2a5   :  { %v531_v6 = vadd.f32 %v595_v8, %v290_v5 }
 0x2a7   :  { %721 = vtanh.f32 %v531_v6 }
 0x2b1   :  { %v722_v9 = vpop.eup %721 }
 0x2b2   :  { %v537_v10 = vmul.f32 %v722_v9, %v536_v7 }
 0x2b4   :  { %539 = vst.msk [vmem:[#allocation6] sm:$0xff] %vm538_vm2, %v537_v10 }
 0x2b5   :  { %756 = shalt.err (!%p753_p12)
}
 0x2b6   :  { %s757_s21 = scalar_lea.hbm %s989_s6, 128 }
 0x2b7   :  { %p758_p13 = scmp.ne.s32.totalorder %s989_s6, %s757_s21  ;;  %p761_p0 = scmp.lt.u32.totalorder %s757_s21, %s989_s6 }
 0x2b9   :  { %p763_p1 = pnand %p761_p0, %p758_p13 }
 0x2bb   :  { %766 = shalt.err (!%p763_p1)
}
 0x2bc   :  { %549 = dma.vmem_to_hbm [thread:$0]  %s547_s18, 128, %s989_s6, [#allocation5]  }
 0x2bd   :  { %769 = dma.done.wait [#allocation5], 128  }
 0x2be   :  { %770 = vsyncadd [#allocation5], 4294967168 }
 0x2bf   :  { %553 = vsyncpa [#allocation4], 1 }
 0x2c0   :  { %554 = vsyncpa [#allocation5], 1 }

</bundles_post_ra>
